<compile_context>
chip_gen: v5e
topology: v5e:2x2
jax: 0.10.0
libtpu: 0.0.40
codegen_flags: <defaults>
</compile_context>

<pallas_src>
import functools

import jax
import jax.numpy as jnp
from jax.experimental import pallas as pl
from jax.experimental.pallas import tpu as pltpu


def _a_cse_kernel(x_ref, mask_l_ref, mask_r_ref,
                  w0m_ref, w0c_ref, w0p_ref, b0_ref,
                  w1_ref, b1_ref, w2_ref, b2_ref,
                  o_ref, *, inv_len, samples_per_block):
    # Grid-invariant operands: load once per step, hoisted out of the unroll.
    mask_l = mask_l_ref[...]            # (1, L) f32, zero at l == 0
    mask_r = mask_r_ref[...]            # (1, L) f32, zero at l == L-1
    w0m = w0m_ref[...]                  # (C, C)  tap for x[l-1]
    w0c = w0c_ref[...]                  # (C, C)  tap for x[l]
    w0p = w0p_ref[...]                  # (C, C)  tap for x[l+1]
    b0 = b0_ref[...]                    # (C, 1)  BN0-folded bias
    w1 = w1_ref[...]                    # (C/2, C)
    b1 = b1_ref[...]                    # (C/2, 1)
    w2 = w2_ref[...]                    # (C, C/2)
    b2 = b2_ref[...]                    # (C, 1)
    L = mask_l.shape[1]

    # Static unroll over the (small) number of samples in this block; every
    # matmul stays a plain 2-D MXU op, everything stays f32.
    for n in range(samples_per_block):
        x = x_ref[n]                                            # (C, L) f32

        # conv0 (k=3, pad=1): shifted copies inside the length-L segment via
        # XLU roll, boundary column zeroed by the precomputed masks.
        x_prev = pltpu.roll(x, 1, axis=1) * mask_l              # x[:, l-1]
        x_next = pltpu.roll(x, L - 1, axis=1) * mask_r          # x[:, l+1]

        # Three taps accumulated in f32 (no concatenate / staging copy).
        y = jnp.dot(w0c, x, preferred_element_type=jnp.float32)
        y = y + jnp.dot(w0m, x_prev, preferred_element_type=jnp.float32)
        y = y + jnp.dot(w0p, x_next, preferred_element_type=jnp.float32)
        y = jnp.maximum(y + b0, 0.0)                            # BN0 folded + ReLU

        # AvgPool1d over the full length: XLU cross-lane reduce, f32.
        p = jnp.sum(y, axis=1, keepdims=True) * inv_len         # (C, 1)

        # conv1 (1x1) + BN (folded) + ReLU
        h = jnp.dot(w1, p, preferred_element_type=jnp.float32) + b1
        h = jnp.maximum(h, 0.0)                                 # (C/2, 1)

        # conv2 (1x1) + BN (folded) + sigmoid (EUP)
        g = jnp.dot(w2, h, preferred_element_type=jnp.float32) + b2
        gate = jax.nn.sigmoid(g)                                # (C, 1) f32

        # Residual fused: in_x * gate + in_x == x * (gate + 1); gate
        # lane-broadcasts over L for free.
        o_ref[n] = (x * (gate + 1.0)).astype(o_ref.dtype)


def _pick_samples_per_block(N, C, L, vmem_cap_bytes=8 << 20):
    """Samples processed per grid step.

    Constraints:
      * nb divides N;
      * double-buffered x/out blocks plus ~5 per-sample f32 intermediates
        (x_prev, x_next, y, gate-broadcast product, output) stay under a cap
        that is conservative even for v7x's 64 MiB/TC;
      * keep >= 2 grid steps whenever N >= 2 so both v7x TensorCores get work
        (grid axis is marked "parallel"); irrelevant on 1-TC v5e/v6e;
      * cap the static unroll length.
    """
    divisors = [d for d in range(1, N + 1) if N % d == 0]

    def fits(nb):
        return (2 * 2 + 5) * nb * C * L * 4 <= vmem_cap_bytes

    cands = [d for d in divisors
             if d <= 8 and fits(d) and (N < 2 or N // d >= 2)]
    return max(cands) if cands else 1


def a_cse_forward(x, params):
    """A_cSE forward on (N, C, L) activations; eval-mode BN folded into convs."""
    N, C, L = x.shape
    w0m, w0c, w0p, b0, w1, b1, w2, b2 = params
    Ch = w1.shape[0]

    nb = _pick_samples_per_block(N, C, L)
    n_blocks = N // nb

    # conv0 boundary masks (constants; same for every block).
    mask_l = (jnp.arange(L) != 0).astype(x.dtype).reshape(1, L)
    mask_r = (jnp.arange(L) != L - 1).astype(x.dtype).reshape(1, L)

    const = lambda i: (0, 0)

    cost = pl.CostEstimate(
        flops=N * (3 * 2 * C * C * L + 2 * Ch * C + 2 * C * Ch + 6 * C * L),
        transcendentals=N * C,
        bytes_accessed=2 * N * C * L * 4
        + (3 * C * C + 2 * C * Ch + 3 * C + Ch + 2 * L) * 4,
    )

    # NOTE: weight/mask blocks are grid-invariant; with constant index_maps the
    # pipeline re-uses the resident copy, so default buffering only costs a few
    # KiB at these sizes (pipeline_mode=pl.Buffered(1) would shave that).
    out = pl.pallas_call(
        functools.partial(_a_cse_kernel, inv_len=1.0 / L, samples_per_block=nb),
        out_shape=jax.ShapeDtypeStruct((N, C, L), x.dtype),
        grid_spec=pltpu.PrefetchScalarGridSpec(
            num_scalar_prefetch=0,
            grid=(n_blocks,),
            in_specs=[
                pl.BlockSpec((nb, C, L), lambda i: (i, 0, 0)),  # activations
                pl.BlockSpec((1, L), const),                    # left-boundary mask
                pl.BlockSpec((1, L), const),                    # right-boundary mask
                pl.BlockSpec((C, C), const),                    # conv0 tap x[l-1]
                pl.BlockSpec((C, C), const),                    # conv0 tap x[l]
                pl.BlockSpec((C, C), const),                    # conv0 tap x[l+1]
                pl.BlockSpec((C, 1), const),                    # conv0 fused bias
                pl.BlockSpec((Ch, C), const),                   # conv1 weight
                pl.BlockSpec((Ch, 1), const),                   # conv1 fused bias
                pl.BlockSpec((C, Ch), const),                   # conv2 weight
                pl.BlockSpec((C, 1), const),                    # conv2 fused bias
            ],
            out_specs=pl.BlockSpec((nb, C, L), lambda i: (i, 0, 0)),
        ),
        compiler_params=pltpu.CompilerParams(
            dimension_semantics=("parallel",),
            vmem_limit_bytes=32 << 20,
        ),
        cost_estimate=cost,
    )(x, mask_l, mask_r, w0m, w0c, w0p, b0, w1, b1, w2, b2)
    return out


def _fold_bn(w, b, gamma, beta, mean, var, eps=1e-5):
    """Fold eval-mode BatchNorm1d into a conv's weight/bias.
    w: (C_out, C_in, K), b: (C_out,)."""
    s = gamma / jnp.sqrt(var + eps)                # (C_out,)
    w_f = w * s[:, None, None]
    b_f = (b - mean) * s + beta
    return w_f, b_f


def make_params(key, C):
    Ch = C // 2
    ks = jax.random.split(key, 16)
    f32 = jnp.float32

    w0 = jax.random.normal(ks[0], (C, C, 3), f32) * 0.2
    b0 = jax.random.normal(ks[1], (C,), f32) * 0.1
    g0 = 1.0 + 0.1 * jax.random.normal(ks[2], (C,), f32)
    be0 = 0.1 * jax.random.normal(ks[3], (C,), f32)
    m0 = 0.1 * jax.random.normal(ks[4], (C,), f32)
    v0 = jax.random.uniform(ks[5], (C,), f32, 0.5, 1.5)

    w1 = jax.random.normal(ks[6], (Ch, C, 1), f32) * 0.3
    b1 = jax.random.normal(ks[7], (Ch,), f32) * 0.1
    g1 = 1.0 + 0.1 * jax.random.normal(ks[8], (Ch,), f32)
    be1 = 0.1 * jax.random.normal(ks[9], (Ch,), f32)
    m1 = 0.1 * jax.random.normal(ks[10], (Ch,), f32)
    v1 = jax.random.uniform(ks[11], (Ch,), f32, 0.5, 1.5)

    w2 = jax.random.normal(ks[12], (C, Ch, 1), f32) * 0.3
    b2 = jax.random.normal(ks[13], (C,), f32) * 0.1
    g2 = 1.0 + 0.1 * jax.random.normal(ks[14], (C,), f32)
    be2 = 0.1 * jax.random.normal(ks[15], (C,), f32)
    m2 = jnp.zeros((C,), f32)
    v2 = jnp.ones((C,), f32)

    w0f, b0f = _fold_bn(w0, b0, g0, be0, m0, v0)
    w1f, b1f = _fold_bn(w1, b1, g1, be1, m1, v1)
    w2f, b2f = _fold_bn(w2, b2, g2, be2, m2, v2)

    params = (
        w0f[:, :, 0], w0f[:, :, 1], w0f[:, :, 2], b0f.reshape(C, 1),
        w1f[:, :, 0], b1f.reshape(Ch, 1),
        w2f[:, :, 0], b2f.reshape(C, 1),
    )
    return params


def a_cse_reference(x, params):
    """Pure-JAX f32 reference matching the PyTorch forward (eval-mode BN)."""
    w0m, w0c, w0p, b0, w1, b1, w2, b2 = params
    N, C, L = x.shape
    xp = jnp.pad(x, ((0, 0), (0, 0), (1, 1)))
    y = (jnp.einsum('oc,ncl->nol', w0m, xp[:, :, 0:L])
         + jnp.einsum('oc,ncl->nol', w0c, xp[:, :, 1:L + 1])
         + jnp.einsum('oc,ncl->nol', w0p, xp[:, :, 2:L + 2]))
    y = jnp.maximum(y + b0[None], 0.0)
    p = jnp.mean(y, axis=2, keepdims=True)
    h = jnp.maximum(jnp.einsum('oc,ncl->nol', w1, p) + b1[None], 0.0)
    g = jnp.einsum('oc,ncl->nol', w2, h) + b2[None]
    gate = jax.nn.sigmoid(g)
    return x * gate + x


if __name__ == "__main__":
    key = jax.random.PRNGKey(0)
    k_x, k_p = jax.random.split(key)

    # A_cSE as used in Huan_net: in_ch = numf*2 = 24 (numf=12); small batch/length.
    N, C, L = 2, 24, 16
    x = jax.random.normal(k_x, (N, C, L), jnp.float32)
    params = make_params(k_p, C)

    fwd = jax.jit(a_cse_forward)
    out = jax.block_until_ready(fwd(x, params))
    ref = a_cse_reference(x, params)

    assert out.shape == (N, C, L)
    # Pool / gate / elementwise stay f32; only the conv matmuls run at MXU
    # default precision, so the tolerance stays mildly loosened vs f32 ref.
    assert jnp.allclose(out, ref, atol=5e-2, rtol=5e-2), "mismatch vs reference"

    print("KERNEL_OK")
</pallas_src>

<mosaic_0001>
module attributes {stable_mosaic.version = 11 : i64} {
  func.func @_a_cse_kernel(%arg0: i32, %arg1: memref<1x24x16xf32, #tpu.memory_space<vmem>>, %arg2: memref<1x16xf32, #tpu.memory_space<vmem>>, %arg3: memref<1x16xf32, #tpu.memory_space<vmem>>, %arg4: memref<24x24xf32, #tpu.memory_space<vmem>>, %arg5: memref<24x24xf32, #tpu.memory_space<vmem>>, %arg6: memref<24x24xf32, #tpu.memory_space<vmem>>, %arg7: memref<24x1xf32, #tpu.memory_space<vmem>>, %arg8: memref<12x24xf32, #tpu.memory_space<vmem>>, %arg9: memref<12x1xf32, #tpu.memory_space<vmem>>, %arg10: memref<24x12xf32, #tpu.memory_space<vmem>>, %arg11: memref<24x1xf32, #tpu.memory_space<vmem>>, %arg12: memref<1x24x16xf32, #tpu.memory_space<vmem>>) attributes {dimension_semantics = [#tpu.dimension_semantics<parallel>], iteration_bounds = array<i64: 2>, scalar_prefetch = 0 : i64, scratch_operands = 0 : i64, tpu.core_type = #tpu.core_type<tc>, window_params = [{transform_indices = @transform_0, window_bounds = array<i64: 1, 24, 16>}, {pipeline_mode = #tpu.pipeline_mode<synchronous>, transform_indices = @transform_1, window_bounds = array<i64: 1, 16>}, {pipeline_mode = #tpu.pipeline_mode<synchronous>, transform_indices = @transform_2, window_bounds = array<i64: 1, 16>}, {pipeline_mode = #tpu.pipeline_mode<synchronous>, transform_indices = @transform_3, window_bounds = array<i64: 24, 24>}, {pipeline_mode = #tpu.pipeline_mode<synchronous>, transform_indices = @transform_4, window_bounds = array<i64: 24, 24>}, {pipeline_mode = #tpu.pipeline_mode<synchronous>, transform_indices = @transform_5, window_bounds = array<i64: 24, 24>}, {pipeline_mode = #tpu.pipeline_mode<synchronous>, transform_indices = @transform_6, window_bounds = array<i64: 24, 1>}, {pipeline_mode = #tpu.pipeline_mode<synchronous>, transform_indices = @transform_7, window_bounds = array<i64: 12, 24>}, {pipeline_mode = #tpu.pipeline_mode<synchronous>, transform_indices = @transform_8, window_bounds = array<i64: 12, 1>}, {pipeline_mode = #tpu.pipeline_mode<synchronous>, transform_indices = @transform_9, window_bounds = array<i64: 24, 12>}, {pipeline_mode = #tpu.pipeline_mode<synchronous>, transform_indices = @transform_10, window_bounds = array<i64: 24, 1>}, {transform_indices = @transform_11, window_bounds = array<i64: 1, 24, 16>}]} {
    %c0 = arith.constant 0 : index
    %c0_0 = arith.constant 0 : index
    %0 = vector.load %arg2[%c0, %c0_0] : memref<1x16xf32, #tpu.memory_space<vmem>>, vector<1x16xf32>
    %c0_1 = arith.constant 0 : index
    %c0_2 = arith.constant 0 : index
    %1 = vector.load %arg3[%c0_1, %c0_2] : memref<1x16xf32, #tpu.memory_space<vmem>>, vector<1x16xf32>
    %c0_3 = arith.constant 0 : index
    %c0_4 = arith.constant 0 : index
    %2 = vector.load %arg4[%c0_3, %c0_4] : memref<24x24xf32, #tpu.memory_space<vmem>>, vector<24x24xf32>
    %c0_5 = arith.constant 0 : index
    %c0_6 = arith.constant 0 : index
    %3 = vector.load %arg5[%c0_5, %c0_6] : memref<24x24xf32, #tpu.memory_space<vmem>>, vector<24x24xf32>
    %c0_7 = arith.constant 0 : index
    %c0_8 = arith.constant 0 : index
    %4 = vector.load %arg6[%c0_7, %c0_8] : memref<24x24xf32, #tpu.memory_space<vmem>>, vector<24x24xf32>
    %c0_9 = arith.constant 0 : index
    %c0_10 = arith.constant 0 : index
    %5 = vector.load %arg7[%c0_9, %c0_10] : memref<24x1xf32, #tpu.memory_space<vmem>>, vector<24x1xf32>
    %c0_11 = arith.constant 0 : index
    %c0_12 = arith.constant 0 : index
    %6 = vector.load %arg8[%c0_11, %c0_12] : memref<12x24xf32, #tpu.memory_space<vmem>>, vector<12x24xf32>
    %c0_13 = arith.constant 0 : index
    %c0_14 = arith.constant 0 : index
    %7 = vector.load %arg9[%c0_13, %c0_14] : memref<12x1xf32, #tpu.memory_space<vmem>>, vector<12x1xf32>
    %c0_15 = arith.constant 0 : index
    %c0_16 = arith.constant 0 : index
    %8 = vector.load %arg10[%c0_15, %c0_16] : memref<24x12xf32, #tpu.memory_space<vmem>>, vector<24x12xf32>
    %c0_17 = arith.constant 0 : index
    %c0_18 = arith.constant 0 : index
    %9 = vector.load %arg11[%c0_17, %c0_18] : memref<24x1xf32, #tpu.memory_space<vmem>>, vector<24x1xf32>
    %c0_19 = arith.constant 0 : index
    %c0_20 = arith.constant 0 : index
    %c0_21 = arith.constant 0 : index
    %10 = vector.load %arg1[%c0_19, %c0_20, %c0_21] : memref<1x24x16xf32, #tpu.memory_space<vmem>>, vector<1x24x16xf32>
    %11 = vector.shape_cast %10 : vector<1x24x16xf32> to vector<24x16xf32>
    %c1_i32 = arith.constant 1 : i32
    %12 = tpu.dynamic_rotate %11 by %c1_i32 dim 1 : vector<24x16xf32>, i32 -> vector<24x16xf32>
    %13 = vector.broadcast %0 : vector<1x16xf32> to vector<24x16xf32>
    %14 = arith.mulf %12, %13 : vector<24x16xf32>
    %c15_i32 = arith.constant 15 : i32
    %15 = tpu.dynamic_rotate %11 by %c15_i32 dim 1 : vector<24x16xf32>, i32 -> vector<24x16xf32>
    %16 = vector.broadcast %1 : vector<1x16xf32> to vector<24x16xf32>
    %17 = arith.mulf %15, %16 : vector<24x16xf32>
    %cst = arith.constant dense<0.000000e+00> : vector<24x16xf32>
    %18 = tpu.matmul %3, %11, %cst {dimension_numbers = #tpu.dot_dimension_numbers<[1], [0], [0], [1], [0, 0, 1, 1], [], []>} : vector<24x24xf32>, vector<24x16xf32>, vector<24x16xf32> -> vector<24x16xf32>
    %cst_22 = arith.constant dense<0.000000e+00> : vector<24x16xf32>
    %19 = tpu.matmul %2, %14, %cst_22 {dimension_numbers = #tpu.dot_dimension_numbers<[1], [0], [0], [1], [0, 0, 1, 1], [], []>} : vector<24x24xf32>, vector<24x16xf32>, vector<24x16xf32> -> vector<24x16xf32>
    %20 = arith.addf %18, %19 : vector<24x16xf32>
    %cst_23 = arith.constant dense<0.000000e+00> : vector<24x16xf32>
    %21 = tpu.matmul %4, %17, %cst_23 {dimension_numbers = #tpu.dot_dimension_numbers<[1], [0], [0], [1], [0, 0, 1, 1], [], []>} : vector<24x24xf32>, vector<24x16xf32>, vector<24x16xf32> -> vector<24x16xf32>
    %22 = arith.addf %20, %21 : vector<24x16xf32>
    %23 = vector.broadcast %5 : vector<24x1xf32> to vector<24x16xf32>
    %24 = arith.addf %22, %23 : vector<24x16xf32>
    %cst_24 = arith.constant 0.000000e+00 : f32
    %25 = vector.broadcast %cst_24 : f32 to vector<24x16xf32>
    %26 = arith.maximumf %24, %25 : vector<24x16xf32>
    %cst_25 = arith.constant dense<0.000000e+00> : vector<24xf32>
    %27 = vector.multi_reduction <add>, %26, %cst_25 [1] : vector<24x16xf32> to vector<24xf32>
    %28 = vector.shape_cast %27 : vector<24xf32> to vector<24x1xf32>
    %cst_26 = arith.constant 6.250000e-02 : f32
    %29 = vector.broadcast %cst_26 : f32 to vector<24x1xf32>
    %30 = arith.mulf %28, %29 : vector<24x1xf32>
    %cst_27 = arith.constant dense<0.000000e+00> : vector<12x1xf32>
    %31 = tpu.matmul %6, %30, %cst_27 {dimension_numbers = #tpu.dot_dimension_numbers<[1], [0], [0], [1], [0, 0, 1, 1], [], []>} : vector<12x24xf32>, vector<24x1xf32>, vector<12x1xf32> -> vector<12x1xf32>
    %32 = arith.addf %31, %7 : vector<12x1xf32>
    %cst_28 = arith.constant 0.000000e+00 : f32
    %33 = vector.broadcast %cst_28 : f32 to vector<12x1xf32>
    %34 = arith.maximumf %32, %33 : vector<12x1xf32>
    %cst_29 = arith.constant dense<0.000000e+00> : vector<24x1xf32>
    %35 = tpu.matmul %8, %34, %cst_29 {dimension_numbers = #tpu.dot_dimension_numbers<[1], [0], [0], [1], [0, 0, 1, 1], [], []>} : vector<24x12xf32>, vector<12x1xf32>, vector<24x1xf32> -> vector<24x1xf32>
    %36 = arith.addf %35, %9 : vector<24x1xf32>
    %37 = arith.negf %36 : vector<24x1xf32>
    %38 = math.exp %37 : vector<24x1xf32>
    %cst_30 = arith.constant 1.000000e+00 : f32
    %39 = vector.broadcast %cst_30 : f32 to vector<24x1xf32>
    %40 = arith.addf %39, %38 : vector<24x1xf32>
    %41 = arith.divf %39, %40 : vector<24x1xf32>
    %cst_31 = arith.constant 1.000000e+00 : f32
    %42 = vector.broadcast %cst_31 : f32 to vector<24x1xf32>
    %43 = arith.addf %41, %42 : vector<24x1xf32>
    %44 = vector.broadcast %43 : vector<24x1xf32> to vector<24x16xf32>
    %45 = arith.mulf %11, %44 : vector<24x16xf32>
    %c0_32 = arith.constant 0 : index
    %c0_33 = arith.constant 0 : index
    %c0_34 = arith.constant 0 : index
    %46 = vector.load %arg12[%c0_32, %c0_33, %c0_34] : memref<1x24x16xf32, #tpu.memory_space<vmem>>, vector<1x24x16xf32>
    %47 = vector.shape_cast %46 : vector<1x24x16xf32> to vector<24x16xf32>
    %48 = vector.shape_cast %45 : vector<24x16xf32> to vector<1x24x16xf32>
    tpu.vector_store %arg12[%c0_32, %c0_33, %c0_34], %48 {strides = array<i32>} : memref<1x24x16xf32, #tpu.memory_space<vmem>>, vector<1x24x16xf32>,
    return
  }
  func.func @transform_0(%arg0: i32) -> (i32, i32, i32) {
    %c0_i32 = arith.constant 0 : i32
    %c0_i32_0 = arith.constant 0 : i32
    %c0_i32_1 = arith.constant 0 : i32
    return %arg0, %c0_i32, %c0_i32_0 : i32, i32, i32
  }
  func.func @transform_1(%arg0: i32) -> (i32, i32) {
    %c0_i32 = arith.constant 0 : i32
    %c0_i32_0 = arith.constant 0 : i32
    %c0_i32_1 = arith.constant 0 : i32
    return %c0_i32, %c0_i32_0 : i32, i32
  }
  func.func @transform_2(%arg0: i32) -> (i32, i32) {
    %c0_i32 = arith.constant 0 : i32
    %c0_i32_0 = arith.constant 0 : i32
    %c0_i32_1 = arith.constant 0 : i32
    return %c0_i32, %c0_i32_0 : i32, i32
  }
  func.func @transform_3(%arg0: i32) -> (i32, i32) {
    %c0_i32 = arith.constant 0 : i32
    %c0_i32_0 = arith.constant 0 : i32
    %c0_i32_1 = arith.constant 0 : i32
    return %c0_i32, %c0_i32_0 : i32, i32
  }
  func.func @transform_4(%arg0: i32) -> (i32, i32) {
    %c0_i32 = arith.constant 0 : i32
    %c0_i32_0 = arith.constant 0 : i32
    %c0_i32_1 = arith.constant 0 : i32
    return %c0_i32, %c0_i32_0 : i32, i32
  }
  func.func @transform_5(%arg0: i32) -> (i32, i32) {
    %c0_i32 = arith.constant 0 : i32
    %c0_i32_0 = arith.constant 0 : i32
    %c0_i32_1 = arith.constant 0 : i32
    return %c0_i32, %c0_i32_0 : i32, i32
  }
  func.func @transform_6(%arg0: i32) -> (i32, i32) {
    %c0_i32 = arith.constant 0 : i32
    %c0_i32_0 = arith.constant 0 : i32
    %c0_i32_1 = arith.constant 0 : i32
    return %c0_i32, %c0_i32_0 : i32, i32
  }
  func.func @transform_7(%arg0: i32) -> (i32, i32) {
    %c0_i32 = arith.constant 0 : i32
    %c0_i32_0 = arith.constant 0 : i32
    %c0_i32_1 = arith.constant 0 : i32
    return %c0_i32, %c0_i32_0 : i32, i32
  }
  func.func @transform_8(%arg0: i32) -> (i32, i32) {
    %c0_i32 = arith.constant 0 : i32
    %c0_i32_0 = arith.constant 0 : i32
    %c0_i32_1 = arith.constant 0 : i32
    return %c0_i32, %c0_i32_0 : i32, i32
  }
  func.func @transform_9(%arg0: i32) -> (i32, i32) {
    %c0_i32 = arith.constant 0 : i32
    %c0_i32_0 = arith.constant 0 : i32
    %c0_i32_1 = arith.constant 0 : i32
    return %c0_i32, %c0_i32_0 : i32, i32
  }
  func.func @transform_10(%arg0: i32) -> (i32, i32) {
    %c0_i32 = arith.constant 0 : i32
    %c0_i32_0 = arith.constant 0 : i32
    %c0_i32_1 = arith.constant 0 : i32
    return %c0_i32, %c0_i32_0 : i32, i32
  }
  func.func @transform_11(%arg0: i32) -> (i32, i32, i32) {
    %c0_i32 = arith.constant 0 : i32
    %c0_i32_0 = arith.constant 0 : i32
    %c0_i32_1 = arith.constant 0 : i32
    return %arg0, %c0_i32, %c0_i32_0 : i32, i32, i32
  }
}

</mosaic_0001>

<bundles_post_ra>
// kernel: a_cse_forward.1
= control target key start
LH: loop header
LB: loop body
LE: loop exit
PB: predicated region body
PF: predicated region fallthrough
CT: control target
= control target key end

     0   :  { %s969_s17 = smov 0   ;;  %s1109_s0 = inlined_call_operand.vmem [shape: f32[2,24,16], index: 0, kind: input, shape index: {}]   ;;  %s1110_s1 = inlined_call_operand.vmem [shape: f32[1,16], index: 1, kind: input, shape index: {}]   ;;  %s1111_s2 = inlined_call_operand.vmem [shape: f32[1,16], index: 2, kind: input, shape index: {}]   ;;  %s1112_s3 = inlined_call_operand.vmem [shape: f32[24,24], index: 3, kind: input, shape index: {}]   ;;  %s1113_s4 = inlined_call_operand.vmem [shape: f32[24,24], index: 4, kind: input, shape index: {}]   ;;  %s1114_s5 = inlined_call_operand.vmem [shape: f32[24,24], index: 5, kind: input, shape index: {}]   ;;  %s1115_s6 = inlined_call_operand.vmem [shape: f32[24,1], index: 6, kind: input, shape index: {}]   ;;  %s1116_s7 = inlined_call_operand.vmem [shape: f32[12,24], index: 7, kind: input, shape index: {}]   ;;  %s1117_s8 = inlined_call_operand.vmem [shape: f32[12,1], index: 8, kind: input, shape index: {}]   ;;  %s1118_s9 = inlined_call_operand.vmem [shape: f32[24,12], index: 9, kind: input, shape index: {}]   ;;  %s1119_s10 = inlined_call_operand.vmem [shape: f32[24,1], index: 10, kind: input, shape index: {}]   ;;  %s1120_s11 = inlined_call_operand.vmem [shape: f32[2,24,16], index: 11, kind: output, shape index: {}]  }
   0x1 LB: > { %s823_s18 = sadd.s32 4294967295, %s901_s17   ;;  %p827_p0 = scmp.ge.s32.totalorder %s901_s17, 1  ;;  %s901_s17 = sphi %s969_s17, %s21_s17  }
   0x2   : > { %p337_p1 = scmp.lt.s32.totalorder %s901_s17, 3 }
   0x4   : > { %p338_p2 = pnand %p827_p0, %p337_p1 }
   0x5   : > { %p377_p3 = scmp.lt.s32.totalorder (!%p338_p2), %s823_s18, 1  ;;  %s903_s23 = smov (!%p338_p2), 16  }
   0x6   : > { %341 = sbr.rel (%p338_p2) target bundleno = 1092 (0x444), region = 64  ;;  %s904_s26 = smov (!%p338_p2), 1  }
   0x7   : > { %s905_s29 = smov (!%p338_p2), 15   ;;  %s906_s30 = smov (!%p338_p2), 127  }
   0x8   : > { %s907_s12 = smov (!%p338_p2), 113  }
   0xb   : > { %s1122_s18 = smov (!%p377_p3, %s823_s18), 1  ;;  %v882_v3 = vld [vmem:[%s1111_s2] ss:$0 sm:$0xff]  ;;  %vm414_vm0 = vcmask 1047680   ;;  %vm461_vm1 = vcmask 195584   ;;  %v393_v31 = vld [vmem:[%s1113_s4 + $0x8] sm:$0xff] }
   0xc   : > { %s853_s19 = smul.u32 24, %s1122_s18  ;;  %443 = vrot.lane.b32.xlu2 %v882_v3, %s904_s26  ;;  %v881_v8 = vld [vmem:[%s1110_s1] ss:$0 sm:$0xff]  ;;  %v394_v34 = vld [vmem:[%s1113_s4 + $0x10] sm:$0xff]  ;;  %v399_v35 = vld [vmem:[%s1115_s6 + $0x8] sm:$0xff]  ;;  %v908_v37 = vmov 0  }
   0xd   : > { %v392_v30 = vld [vmem:[%s1113_s4] sm:$0xff]  ;;  %v400_v36 = vld [vmem:[%s1115_s6 + $0x10] sm:$0xff]  ;;  %879 = vset.pattern.permute.xlu1 %v908_v37  ;;  %878 = vset.pattern.permute.xlu0 %v908_v37  ;;  %v396_v39 = vld [vmem:[%s1114_s5 + $0x8] sm:$0xff]  ;;  %vm603_vm2 = vcmask 130048   ;;  %vm657_vm3 = vcmask 1043456   ;;  %vm647_vm4 = vcmask 97280  }
   0xe   : > { %s381_s22 = scalar_lea.vmem %s1109_s0, %s853_s19  ;;  %v395_v32 = vld [vmem:[%s1114_s5] sm:$0xff]  ;;  %880 = vset.pattern.permute.xlu2 %v908_v37  ;;  %v397_v45 = vld [vmem:[%s1114_s5 + $0x10] sm:$0xff]  ;;  %v390_v46 = vld [vmem:[%s1112_s3 + $0x8] sm:$0xff] }
   0xf   : > { %v985_v0 = vld [vmem:[%s381_s22 + $0x10] sm:$0xff]  ;;  %v987_v1 = vld [vmem:[%s381_s22] sm:$0xff]  ;;  %v992_v2 = vld [vmem:[%s381_s22 + $0x8] sm:$0xff] }
  0x10   : > { %421 = vrot.lane.b32.xlu0 %v985_v0, %s903_s23  ;;  %415 = vrot.lane.b32.xlu1 %v987_v1, %s903_s23  ;;  %v398_v38 = vld [vmem:[%s1115_s6] sm:$0xff]  ;;  %v391_v47 = vld [vmem:[%s1112_s3 + $0x10] sm:$0xff] }
  0x11   : > { %519 = vmatpush.msra.mxu1 %v985_v0  ;;  %v389_v43 = vld [vmem:[%s1112_s3] sm:$0xff]  ;;  %v409_v37 = vld [vmem:[%s1119_s10 + $0x8] sm:$0xff] }
  0x13   : > { %520 = vmatpush.msra.mxu1 %v992_v2 }
  0x15   : > { %521 = vmatpush.msra.mxu1 %v987_v1 }
  0x16   : > { %833 = vmatmul.msk.f32.vlgmr.msra.gmra.mxu1 %vm461_vm1, %v392_v30  ;;  %v405_v30 = vld [vmem:[%s1118_s9] sm:$0xff] }
  0x18   : > { %418 = vrot.lane.b32.xlu0 %v992_v2, %s903_s23 }
  0x1e   : > { %834 = vmatmul.msk.f32.gmra.mxu1 %vm461_vm1, %v393_v31  ;;  %v406_v31 = vld [vmem:[%s1118_s9 + $0x8] sm:$0xff] }
  0x26   : > { %835 = vmatmul.msk.f32.gmra.mxu1 %vm461_vm1, %v394_v34 }
  0x66   : > { %v444_v11 = vpop.permute.xlu2 %443 }
  0x82   : > { %v422_v4 = vpop.permute.xlu0 %421  ;;  %v416_v5 = vpop.permute.xlu1 %415 }
  0x83   : > { %v423_v6 = vsel %vm414_vm0, %v422_v4, %v985_v0  ;;  %v417_v7 = vsel %vm414_vm0, %v416_v5, %v987_v1 }
  0x84   : > { %428 = vrot.lane.b32.xlu1 %v423_v6, %s903_s23  ;;  %424 = vrot.lane.b32.xlu0 %v417_v7, %s903_s23 }
  0x8a   : > { %v419_v9 = vpop.permute.xlu0 %418 }
  0x8b   : > { %v420_v10 = vsel %vm414_vm0, %v419_v9, %v992_v2 }
  0x8c   : > { %435 = vrot.lane.b32.xlu1 %v881_v8, %s905_s29  ;;  %426 = vrot.lane.b32.xlu2 %v420_v10, %s903_s23 }
  0x93   : > { %v523_v48 = vpop.f32.mrf.mxu1 }
  0x9b   : > { %v526_v54 = vpop.f32.mrf.mxu1 }
  0xa3   : > { %v529_v3 = vpop.f32.mrf.mxu1 }
  0xe6   : > { %v427_v12 = vpop.permute.xlu2 %426 }
  0xe7   : > { %v431_v13 = vsel %vm414_vm0, %v427_v12, %v992_v2 }
  0xe8   : > { %v447_v18 = vmul.f32 %v444_v11, %v431_v13 }
  0xf6   : > { %v425_v14 = vpop.permute.xlu0 %424  ;;  %v429_v15 = vpop.permute.xlu1 %428 }
  0xf7   : > { %v430_v16 = vsel %vm414_vm0, %v425_v14, %v987_v1  ;;  %v432_v17 = vsel %vm414_vm0, %v429_v15, %v985_v0 }
  0xf8   : > { %v446_v19 = vmul.f32 %v444_v11, %v430_v16  ;;  %v448_v20 = vmul.f32 %v444_v11, %v432_v17 }
  0xfa   : > { %535 = vrot.lane.b32.xlu1 %v446_v19, %s906_s30  ;;  %v868_v21 = vpack.i.bf16 %v447_v18, %v448_v20  ;;  %v402_v20 = vld [vmem:[%s1116_s7 + $0x8] sm:$0xf] }
  0xfc   : > { %869 = vrot.lane.b32.xlu2 %v868_v21, %s906_s30  ;;  %v401_v21 = vld [vmem:[%s1116_s7] sm:$0xff]  ;;  %s386_s30 = scalar_lea.vmem %s1120_s11, %s853_s19 }
  0xfe   : > { %v436_v22 = vpop.permute.xlu1 %435 }
  0xff   : > { %v439_v23 = vmul.f32 %v436_v22, %v431_v13  ;;  %v440_v24 = vmul.f32 %v436_v22, %v432_v17  ;;  %v438_v26 = vmul.f32 %v436_v22, %v430_v16  ;;  %v403_v22 = vld [vmem:[%s1117_s8] sm:$0xff] }
 0x101   : > { %v873_v25 = vpack.i.bf16 %v439_v23, %v440_v24  ;;  %v404_v24 = vld [vmem:[%s1117_s8 + $0x8] sm:$0xf] }
 0x102   : > { %589 = vperm.xlu1 %879, %v399_v35  }
 0x103   : > { %874 = vrot.lane.b32.xlu0 %v873_v25, %s907_s12 }
 0x104   : > { %452 = vrot.lane.b32.xlu2 %v438_v26, %s907_s12 }
 0x10b   : > { %594 = vperm.xlu0 %878, %v400_v36  }
 0x10c   : > { %584 = vperm.xlu2 %880, %v398_v38  }
 0x156   : > { %v870_v27 = vpop.permute.xlu2 %869 }
 0x157   : > { %v871_v28 = vunpack.i.l.bf16 %v870_v27  ;;  %v872_v29 = vunpack.i.h.bf16 %v870_v27 }
 0x159   : > { %566 = vmatpush.msra.mxu2 %v871_v28 }
 0x15b   : > { %567 = vmatpush.msra.mxu2 %v872_v29 }
 0x15e   : > { %v453_v44 = vpop.permute.xlu2 %452 }
 0x166   : > { %v585_v52 = vpop.permute.xlu2 %584 }
 0x16c   : > { %v536_v33 = vpop.permute.xlu1 %535 }
 0x16d   : > { %568 = vmatpush.msra.mxu2 %v536_v33  ;;  %v408_v33 = vld [vmem:[%s1119_s10] sm:$0xff] }
 0x16e   : > { %836 = vmatmul.msk.f32.vlgmr.msra.gmra.mxu2 %vm461_vm1, %v395_v32  ;;  %v407_v32 = vld [vmem:[%s1118_s9 + $0x10] sm:$0xff] }
 0x174   : > { %v590_v61 = vpop.permute.xlu1 %589 }
 0x175   : > { %v875_v40 = vpop.permute.xlu0 %874 }
 0x176   : > { %v876_v41 = vunpack.i.l.bf16 %v875_v40  ;;  %837 = vmatmul.msk.f32.gmra.mxu2 %vm461_vm1, %v396_v39  ;;  %v877_v42 = vunpack.i.h.bf16 %v875_v40 }
 0x178   : > { %484 = vmatpush.msra.mxu0 %v876_v41 }
 0x17a   : > { %485 = vmatpush.msra.mxu0 %v877_v42 }
 0x17c   : > { %486 = vmatpush.msra.mxu0 %v453_v44 }
 0x17d   : > { %830 = vmatmul.msk.f32.vlgmr.msra.gmra.mxu0 %vm461_vm1, %v389_v43  ;;  %v595_v9 = vpop.permute.xlu0 %594  ;;  %v410_v43 = vld [vmem:[%s1119_s10 + $0x10] sm:$0xff] }
 0x17e   : > { %838 = vmatmul.msk.f32.gmra.mxu2 %vm461_vm1, %v397_v45 }
 0x185   : > { %831 = vmatmul.msk.f32.gmra.mxu0 %vm461_vm1, %v390_v46 }
 0x18d   : > { %832 = vmatmul.msk.f32.gmra.mxu0 %vm461_vm1, %v391_v47 }
 0x1f1   : > { %v570_v49 = vpop.f32.mrf.mxu2 }
 0x1f9   : > { %v573_v56 = vpop.f32.mrf.mxu2 }
 0x1fa   : > { %v488_v50 = vpop.f32.mrf.mxu0 }
 0x1fb   : > { %v524_v51 = vadd.f32 %v523_v48, %v488_v50 }
 0x1fd   : > { %v579_v53 = vadd.f32 %v570_v49, %v524_v51 }
 0x1ff   : > { %v597_v55 = vadd.f32 %v585_v52, %v579_v53 }
 0x201   : > { %v600_v57 = vmax.f32 %v597_v55, 0.0  ;;  %v576_v6 = vpop.f32.mrf.mxu2 }
 0x202   : > { %v491_v58 = vpop.f32.mrf.mxu0 }
 0x203   : > { %v527_v59 = vadd.f32 %v526_v54, %v491_v58  ;;  %v604_v60 = vsel %vm603_vm2, %v600_v57, 0.0 }
 0x204   : > { %605 = vadd.xlane.f32.xlu0 %v604_v60 }
 0x205   : > { %v580_v62 = vadd.f32 %v573_v56, %v527_v59 }
 0x207   : > { %v598_v63 = vadd.f32 %v590_v61, %v580_v62 }
 0x209   : > { %v601_v4 = vmax.f32 %v598_v63, 0.0 }
 0x20a   : > { %v494_v5 = vpop.f32.mrf.mxu0 }
 0x20b   : > { %v530_v7 = vadd.f32 %v529_v3, %v494_v5  ;;  %v607_v8 = vsel %vm603_vm2, %v601_v4, 0.0 }
 0x20c   : > { %608 = vadd.xlane.f32.xlu2 %v607_v8 }
 0x20d   : > { %v581_v10 = vadd.f32 %v576_v6, %v530_v7 }
 0x20f   : > { %v599_v11 = vadd.f32 %v595_v9, %v581_v10 }
 0x211   : > { %v602_v12 = vmax.f32 %v599_v11, 0.0 }
 0x213   : > { %v610_v13 = vsel %vm603_vm2, %v602_v12, 0.0 }
 0x214   : > { %611 = vadd.xlane.f32.xlu1 %v610_v13 }
 0x277   : > { %v606_v17 = vpop.xlane.xlu0 %605 }
 0x278   : > { %v613_v19 = vmul.f32 0.0625, %v606_v17 }
 0x27f   : > { %v609_v14 = vpop.xlane.xlu2 %608 }
 0x280   : > { %v614_v18 = vmul.f32 0.0625, %v609_v14 }
 0x287   : > { %v612_v15 = vpop.xlane.xlu1 %611 }
 0x288   : > { %v615_v16 = vmul.f32 0.0625, %v612_v15 }
 0x28a   : > { %635 = vmatpush.msrb.mxu0 %v615_v16  ;;  %850 = vmatpush.msra.mxu3 %v615_v16 }
 0x28c   : > { %636 = vmatpush.msrb.mxu0 %v614_v18  ;;  %851 = vmatpush.msra.mxu3 %v614_v18 }
 0x28e   : > { %637 = vmatpush.msrb.mxu0 %v613_v19  ;;  %852 = vmatpush.msra.mxu3 %v613_v19 }
 0x28f   : > { %840 = vmatmul.msk.f32.vlgmr.msra.gmra.mxu3 %vm461_vm1, %v402_v20  ;;  %839 = vmatmul.msk.f32.vlgmr.msrb.gmra.mxu0 %vm461_vm1, %v401_v21 }
 0x30c   : > { %v639_v23 = vpop.f32.mrf.mxu0 }
 0x30d   : > { %v640_v25 = vadd.f32 %v639_v23, %v403_v22 }
 0x30f   : > { %v645_v29 = vmax.f32 %v640_v25, 0.0 }
 0x312   : > { %v642_v26 = vpop.f32.mrf.mxu3 }
 0x313   : > { %v643_v27 = vadd.f32 %v642_v26, %v404_v24 }
 0x315   : > { %v646_v28 = vmax.f32 %v643_v27, 0.0 }
 0x317   : > { %841 = vmatpush.msk.msrb.mxu3 %vm657_vm3, %v646_v28 }
 0x319   : > { %676 = vmatpush.msrb.mxu3 %v645_v29 }
 0x31a   : > { %842 = vmatmul.msk.f32.vlgmr.msrb.gmra.mxu3 %vm647_vm4, %v405_v30 }
 0x322   : > { %843 = vmatmul.msk.f32.gmra.mxu3 %vm647_vm4, %v406_v31 }
 0x32a   : > { %844 = vmatmul.msk.f32.gmra.mxu3 %vm647_vm4, %v407_v32 }
 0x39d   : > { %v678_v34 = vpop.f32.mrf.mxu3 }
 0x39e   : > { %v679_v35 = vadd.f32 %v678_v34, %v408_v33 }
 0x3a0   : > { %v845_v36 = vmul.f32 -1.442695, %v679_v35 }
 0x3a2   : > { %883 = vpow2.f32 %v845_v36 }
 0x3a5   : > { %v681_v38 = vpop.f32.mrf.mxu3 }
 0x3a6   : > { %v682_v39 = vadd.f32 %v681_v38, %v409_v37 }
 0x3a8   : > { %v884_v40 = vpop.eup %883  ;;  %v846_v41 = vmul.f32 -1.442695, %v682_v39 }
 0x3a9   : > { %v696_v42 = vadd.f32 1.0, %v884_v40 }
 0x3aa   : > { %885 = vpow2.f32 %v846_v41 }
 0x3ab   : > { %887 = vrcp.f32 %v696_v42  ;;  %v710_v52 = vand.u32 2147483648, %v696_v42  ;;  %v708_v54 = vand.u32 2147483647, %v696_v42  ;;  %vm704_vm6 = vweird.f32 %v696_v42 }
 0x3ad   : > { %v684_v44 = vpop.f32.mrf.mxu3  ;;  %v711_v59 = vor.u32 1.1754944e-38, %v710_v52  ;;  %vm709_vm8 = vcmp.eq.f32.partialorder %v708_v54, 8.507059e+37 }
 0x3ae   : > { %v685_v45 = vadd.f32 %v684_v44, %v410_v43 }
 0x3b0   : > { %v886_v46 = vpop.eup %885  ;;  %v847_v47 = vmul.f32 -1.442695, %v685_v45 }
 0x3b1   : > { %v888_v48 = vpop.eup %887  ;;  %v697_v49 = vadd.f32 1.0, %v886_v46 }
 0x3b2   : > { %889 = vpow2.f32 %v847_v47  ;;  %v700_v50 = vmul.f32 %v888_v48, %v696_v42  ;;  %vm705_vm5 = vweird.f32 %v888_v48 }
 0x3b3   : > { %891 = vrcp.f32 %v697_v49  ;;  %vm706_vm7 = vmor %vm704_vm6, %vm705_vm5  ;;  %v725_v4 = vand.u32 2147483648, %v697_v49  ;;  %v723_v6 = vand.u32 2147483647, %v697_v49  ;;  %vm719_vm10 = vweird.f32 %v697_v49 }
 0x3b4   : > { %v701_v51 = vsub.f32 1.0, %v700_v50 }
 0x3b5   : > { %v726_v9 = vor.u32 1.1754944e-38, %v725_v4  ;;  %vm724_vm12 = vcmp.eq.f32.partialorder %v723_v6, 8.507059e+37 }
 0x3b6   : > { %v702_v53 = vmul.f32 %v888_v48, %v701_v51 }
 0x3b8   : > { %v890_v55 = vpop.eup %889  ;;  %v703_v56 = vadd.f32 %v888_v48, %v702_v53 }
 0x3b9   : > { %v892_v57 = vpop.eup %891  ;;  %v698_v58 = vadd.f32 1.0, %v890_v55 }
 0x3ba   : > { %v707_v60 = vsel %vm706_vm7, %v888_v48, %v703_v56  ;;  %v715_v61 = vmul.f32 %v892_v57, %v697_v49  ;;  %vm720_vm9 = vweird.f32 %v892_v57 }
 0x3bb   : > { %893 = vrcp.f32 %v698_v58  ;;  %v712_v62 = vsel %vm709_vm8, %v711_v59, %v707_v60  ;;  %vm721_vm11 = vmor %vm719_vm10, %vm720_vm9  ;;  %v740_v15 = vand.u32 2147483648, %v698_v58  ;;  %v738_v17 = vand.u32 2147483647, %v698_v58 }
 0x3bc   : > { %v744_v63 = vadd.f32 1.0, %v712_v62  ;;  %v716_v3 = vsub.f32 1.0, %v715_v61  ;;  %vm734_vm14 = vweird.f32 %v698_v58 }
 0x3bd   : > { %v741_v19 = vor.u32 1.1754944e-38, %v740_v15  ;;  %vm739_vm0 = vcmp.eq.f32.partialorder %v738_v17, 8.507059e+37 }
 0x3be   : > { %749 = vperm.xlu2 %880, %v744_v63   ;;  %v717_v5 = vmul.f32 %v892_v57, %v716_v3 }
 0x3c0   : > { %v718_v7 = vadd.f32 %v892_v57, %v717_v5 }
 0x3c1   : > { %v894_v8 = vpop.eup %893 }
 0x3c2   : > { %v722_v10 = vsel %vm721_vm11, %v892_v57, %v718_v7  ;;  %v730_v11 = vmul.f32 %v894_v8, %v698_v58  ;;  %vm735_vm13 = vweird.f32 %v894_v8 }
 0x3c3   : > { %v727_v12 = vsel %vm724_vm12, %v726_v9, %v722_v10  ;;  %vm736_vm15 = vmor %vm734_vm14, %vm735_vm13 }
 0x3c4   : > { %v745_v13 = vadd.f32 1.0, %v727_v12  ;;  %v731_v14 = vsub.f32 1.0, %v730_v11 }
 0x3c6   : > { %754 = vperm.xlu1 %879, %v745_v13   ;;  %v732_v16 = vmul.f32 %v894_v8, %v731_v14 }
 0x3c8   : > { %v733_v18 = vadd.f32 %v894_v8, %v732_v16 }
 0x3ca   : > { %v737_v20 = vsel %vm736_vm15, %v894_v8, %v733_v18 }
 0x3cb   : > { %v742_v21 = vsel %vm739_vm0, %v741_v19, %v737_v20 }
 0x3cc   : > { %v746_v22 = vadd.f32 1.0, %v742_v21 }
 0x3ce   : > { %759 = vperm.xlu0 %878, %v746_v22  }
 0x418   : > { %v750_v23 = vpop.permute.xlu2 %749 }
 0x419   : > { %v762_v24 = vmul.f32 %v750_v23, %v987_v1 }
 0x41b   : > { %765 = vst.msk [vmem:[%s386_s30] sm:$0xff] %vm603_vm2, %v762_v24 }
 0x438   : > { %v755_v25 = vpop.permute.xlu1 %754 }
 0x439   : > { %v763_v26 = vmul.f32 %v755_v25, %v992_v2 }
 0x43b   : > { %766 = vst.msk [vmem:[%s386_s30 + $0x8] sm:$0xff] %vm603_vm2, %v763_v26 }
 0x440   : > { %v760_v27 = vpop.permute.xlu0 %759 }
 0x441   : > { %v764_v28 = vmul.f32 %v760_v27, %v985_v0 }
 0x443   : > { %767 = vst.msk [vmem:[%s386_s30 + $0x10] sm:$0xff] %vm603_vm2, %v764_v28 }
 0x444 PF: > { %s21_s17 = sadd.s32 1, %s901_s17  }
 0x445   : > { %p18_p4 = scmp.ge.s32.totalorder %s21_s17, 4  }
 0x447   :  { %20 = sbr.rel (!%p18_p4) target bundleno = 1 (0x1), region = 94 }

</bundles_post_ra>
